<compile_context>
chip_gen: v6e
topology: v6e:2x2x1
jax: 0.10.0
libtpu: 0.0.40
codegen_flags: <defaults>
</compile_context>

<pallas_src>
import functools

import jax
import jax.numpy as jnp
from jax.experimental import pallas as pl
from jax.experimental.pallas import tpu as pltpu


def _cdiv(a, b):
    return (a + b - 1) // b


def _round_up(a, b):
    return _cdiv(a, b) * b


def _device_plan():
    """Returns (ncores, vmem_limit_bytes_or_None, vmem_working_budget_bytes)."""
    try:
        kind = jax.devices()[0].device_kind.lower()
    except Exception:
        kind = ""
    if "v7" in kind or "7x" in kind:
        # v7x: 2 TensorCores/chip, only 64 MiB VMEM per core.
        return 2, 48 * 2**20, 36 * 2**20
    if ("v6" in kind or "v5e" in kind or "v5 lite" in kind or "v5lite" in kind
            or "lite" in kind):
        # v5e / v6e: single TensorCore, 128 MiB VMEM.
        return 1, 96 * 2**20, 72 * 2**20
    # Unknown / older generation: stay under the default scoped-VMEM limit.
    return 1, None, 12 * 2**20


def _custom_loss_kernel(*refs, n_cont, cat_sizes, total_rows):
    """One batch tile: accumulate [sum squared error, sum -tgt*log_softmax].

    refs = (output, target_continuous, *cat_targets, part_out, sq_acc, ce_acc)
      output            : (TB, D)    full prediction slab (split in-kernel)
      target_continuous : (TB, n_cont)
      cat_targets[g]    : (TB, C_g)  soft probability targets per group
      part_out          : (8, 128)   per-core partial sums ([0,0]=sq, [0,1]=ce)
      sq_acc, ce_acc    : (8, 128)   resident VMEM scratch accumulators
    """
    n_cat = len(cat_sizes)
    out_ref = refs[0]
    tcont_ref = refs[1]
    cat_refs = refs[2:2 + n_cat]
    part_ref = refs[2 + n_cat]
    sq_acc_ref = refs[3 + n_cat]
    ce_acc_ref = refs[4 + n_cat]

    core = pl.program_id(0)
    step = pl.program_id(1)
    n_steps = pl.num_programs(1)

    @pl.when(step == 0)
    def _init():
        sq_acc_ref[...] = jnp.zeros_like(sq_acc_ref)
        ce_acc_ref[...] = jnp.zeros_like(ce_acc_ref)

    tb = out_ref.shape[0]
    d_full = out_ref.shape[1]

    # Ragged-batch handling: rows whose global index is >= total_rows (garbage
    # read from the partial / clamped edge blocks) are masked out of every
    # reduction, so they contribute exactly zero.
    block_start = (core * n_steps + step) * tb
    rem = total_rows - block_start
    row = jax.lax.broadcasted_iota(jnp.int32, (tb, 1), 0)
    row_ok = row < rem                                     # (tb, 1) bool

    out_full = out_ref[...].astype(jnp.float32)            # (tb, D)

    # ----- sum of squared error over the continuous columns -----
    oc = out_full[:, :n_cont]
    tc = tcont_ref[...].astype(jnp.float32)
    diff = jnp.where(row_ok, oc - tc, 0.0)
    sq_blk = jnp.sum(diff * diff, keepdims=True)           # (1, 1)

    # ----- summed soft-target cross entropy over all categorical groups -----
    ce_blk = jnp.zeros((1, 1), jnp.float32)
    if n_cat:
        neg_big = jnp.float32(-1e30)
        lane = jax.lax.broadcasted_iota(jnp.int32, (1, d_full), 1)

        offs = []
        off = n_cont
        for c in cat_sizes:
            offs.append(off)
            off += c
        cat_end = off

        # Per-group max, broadcast back onto that group's lanes.
        gmax_full = jnp.zeros_like(out_full)
        for o, c in zip(offs, cat_sizes):
            gmask = jnp.logical_and(lane >= o, lane < o + c)
            masked = jnp.where(jnp.logical_and(gmask, row_ok), out_full, neg_big)
            gmax = jnp.max(masked, axis=-1, keepdims=True)           # (tb, 1)
            gmax_full = gmax_full + jnp.where(gmask, gmax, 0.0)

        # Shift, mask, then a single exp over the whole categorical region
        # (invalid lanes/rows underflow to 0; no inf/NaN enters a reduction).
        cat_mask = jnp.logical_and(lane >= n_cont, lane < cat_end)
        shifted = jnp.where(jnp.logical_and(cat_mask, row_ok),
                            out_full - gmax_full, neg_big)
        expz = jnp.exp(shifted)                                      # one EUP pass

        # Per-group log-sum-exp, broadcast back onto the group's lanes.
        lse_full = jnp.zeros_like(out_full)
        for o, c in zip(offs, cat_sizes):
            gmask = jnp.logical_and(lane >= o, lane < o + c)
            gsum = jnp.sum(jnp.where(gmask, expz, 0.0), axis=-1, keepdims=True)
            lse_full = lse_full + jnp.where(gmask, jnp.log(gsum), 0.0)

        log_sm = out_full - gmax_full - lse_full          # valid on group lanes

        for g, (o, c) in enumerate(zip(offs, cat_sizes)):
            tgt = cat_refs[g][...].astype(jnp.float32)               # (tb, C_g)
            ls = log_sm[:, o:o + c]
            ce_blk = ce_blk - jnp.sum(jnp.where(row_ok, tgt * ls, 0.0),
                                      keepdims=True)

    # Accumulate the two (1,1) partial sums into resident scratch tiles
    # (broadcast over the (8,128) tile; element [0,0] carries the value).
    sq_acc_ref[...] = sq_acc_ref[...] + sq_blk
    ce_acc_ref[...] = ce_acc_ref[...] + ce_blk

    # Write the per-core output tile exactly once, on the last batch step.
    @pl.when(step == n_steps - 1)
    def _store():
        r = jax.lax.broadcasted_iota(jnp.int32, part_ref.shape, 0)
        c = jax.lax.broadcasted_iota(jnp.int32, part_ref.shape, 1)
        is_sq = jnp.logical_and(r == 0, c == 0)
        is_ce = jnp.logical_and(r == 0, c == 1)
        part_ref[...] = (jnp.where(is_sq, sq_acc_ref[...], 0.0)
                         + jnp.where(is_ce, ce_acc_ref[...], 0.0))


def custom_loss(output, target_continuous, target_categorical, weight_param,
                *, max_rows_per_step=None):
    """Pallas implementation of CustomLoss.forward.

    output:             (B, D) float   (first n_cont cols continuous, then groups)
    target_continuous:  (B, n_cont) float
    target_categorical: list of (B, C_g) float probability targets
    weight_param:       python float or jnp scalar (never baked into the kernel)
    """
    output = jnp.asarray(output)
    target_continuous = jnp.asarray(target_continuous)
    target_categorical = [jnp.asarray(t) for t in target_categorical]

    B, D = output.shape
    n_cont = int(target_continuous.shape[1])
    cat_sizes = tuple(int(t.shape[1]) for t in target_categorical)
    sum_c = sum(cat_sizes)

    if n_cont < 1:
        raise ValueError("target_continuous needs >= 1 column "
                         "(F.mse_loss over an empty slice is undefined).")
    if n_cont + sum_c > D:
        raise ValueError("output has fewer columns than "
                         "n_cont + sum(categorical group sizes).")

    ncores, vmem_limit, vmem_budget = _device_plan()
    operands = [output, target_continuous] + target_categorical

    # ----- choose the batch tile TB from lane-padded VMEM bytes -----
    row_tile = 8
    bytes_per_row = 0
    for arr in operands:
        itemsize = jnp.dtype(arr.dtype).itemsize
        bytes_per_row += _round_up(arr.shape[1], 128) * itemsize   # lane padding
        row_tile = max(row_tile, 8 * max(1, 4 // itemsize))        # 8 f32 / 16 bf16

    tb = vmem_budget // (2 * bytes_per_row)                        # x2 double buffers
    tb = min(tb, 8192, _round_up(_cdiv(B, ncores), row_tile))
    if max_rows_per_step is not None:
        tb = min(tb, int(max_rows_per_step))
    tb = max(row_tile, (tb // row_tile) * row_tile)

    blocks_total = _cdiv(B, tb)            # block indices < blocks_total touch real rows
    n_steps = _cdiv(blocks_total, ncores)

    # Block indices past the last real block are clamped here (no DMA ever
    # starts beyond the array); inside the kernel their nominal row offset is
    # >= B, so every row is masked and they contribute zero.
    def row_map(c, i):
        return (jnp.minimum(c * n_steps + i, blocks_total - 1), 0)

    in_specs = ([pl.BlockSpec((tb, D), row_map),
                 pl.BlockSpec((tb, n_cont), row_map)]
                + [pl.BlockSpec((tb, csz), row_map) for csz in cat_sizes])

    kernel = functools.partial(_custom_loss_kernel, n_cont=n_cont,
                               cat_sizes=cat_sizes, total_rows=B)

    parts = pl.pallas_call(
        kernel,
        out_shape=jax.ShapeDtypeStruct((ncores * 8, 128), jnp.float32),
        grid=(ncores, n_steps),
        in_specs=in_specs,
        out_specs=pl.BlockSpec((8, 128), lambda c, i: (c, 0)),
        scratch_shapes=[pltpu.VMEM((8, 128), jnp.float32),
                        pltpu.VMEM((8, 128), jnp.float32)],
        compiler_params=pltpu.CompilerParams(
            dimension_semantics=("parallel", "arbitrary"),
            vmem_limit_bytes=vmem_limit),
    )(*operands)

    # ----- epilogue (runs once, in XLA): combine per-core partial sums -----
    parts = parts.reshape(ncores, 8, 128)
    sq_total = jnp.sum(parts[:, 0, 0])
    ce_total = jnp.sum(parts[:, 0, 1])

    mse = sq_total / jnp.float32(B * n_cont)
    ce = ce_total / jnp.float32(B)
    w = jnp.asarray(weight_param, dtype=jnp.float32)
    return w * mse + (jnp.float32(1.0) - w) * ce


def custom_loss_ref(output, target_continuous, target_categorical, weight_param):
    """Pure-JAX reference mirroring the PyTorch semantics."""
    n_cont = target_continuous.shape[1]
    mse = jnp.mean((output[:, :n_cont] - target_continuous) ** 2)
    ce_total = 0.0
    start = n_cont
    for tgt in target_categorical:
        c = tgt.shape[1]
        logits = output[:, start:start + c]
        log_sm = jax.nn.log_softmax(logits, axis=-1)
        ce_total = ce_total + jnp.mean(-jnp.sum(tgt * log_sm, axis=-1))
        start += c
    return weight_param * mse + (1.0 - weight_param) * ce_total


if __name__ == "__main__":
    n_cont = 6
    cat_sizes = (4, 5)
    D = n_cont + sum(cat_sizes)
    weight_param = 0.7

    def make_inputs(batch, key):
        k1, k2, k3, k4 = jax.random.split(key, 4)
        out = jax.random.normal(k1, (batch, D), dtype=jnp.float32)
        tcont = jax.random.normal(k2, (batch, n_cont), dtype=jnp.float32)
        tcat = [
            jax.nn.softmax(jax.random.normal(k3, (batch, cat_sizes[0]),
                                             dtype=jnp.float32), axis=-1),
            jax.nn.softmax(jax.random.normal(k4, (batch, cat_sizes[1]),
                                             dtype=jnp.float32), axis=-1),
        ]
        return out, tcont, tcat

    # 1) small, tile-aligned batch
    o, tc, tcat = make_inputs(8, jax.random.PRNGKey(0))
    loss = jax.block_until_ready(custom_loss(o, tc, tcat, weight_param))
    ref = custom_loss_ref(o, tc, tcat, weight_param)
    assert jnp.allclose(loss, ref, atol=1e-5, rtol=1e-5), (loss, ref)

    # 2) ragged batch exercising multi-step accumulation + row masking
    o, tc, tcat = make_inputs(37, jax.random.PRNGKey(1))
    loss = jax.block_until_ready(
        custom_loss(o, tc, tcat, weight_param, max_rows_per_step=16))
    ref = custom_loss_ref(o, tc, tcat, weight_param)
    assert jnp.allclose(loss, ref, atol=1e-5, rtol=1e-5), (loss, ref)

    print("KERNEL_OK")
</pallas_src>

<mosaic_0001>
module attributes {stable_mosaic.version = 11 : i64} {
  func.func @_custom_loss_kernel(%arg0: i32, %arg1: i32, %arg2: memref<8x15xf32, #tpu.memory_space<vmem>>, %arg3: memref<8x6xf32, #tpu.memory_space<vmem>>, %arg4: memref<8x4xf32, #tpu.memory_space<vmem>>, %arg5: memref<8x5xf32, #tpu.memory_space<vmem>>, %arg6: memref<8x128xf32, #tpu.memory_space<vmem>>, %arg7: memref<8x128xf32, #tpu.memory_space<vmem>>, %arg8: memref<8x128xf32, #tpu.memory_space<vmem>>) attributes {dimension_semantics = [#tpu.dimension_semantics<parallel>, #tpu.dimension_semantics<arbitrary>], iteration_bounds = array<i64: 1, 1>, scalar_prefetch = 0 : i64, scratch_operands = 2 : i64, tpu.core_type = #tpu.core_type<tc>, window_params = [{transform_indices = @transform_0, window_bounds = array<i64: 8, 15>}, {transform_indices = @transform_1, window_bounds = array<i64: 8, 6>}, {transform_indices = @transform_2, window_bounds = array<i64: 8, 4>}, {transform_indices = @transform_3, window_bounds = array<i64: 8, 5>}, {transform_indices = @transform_4, window_bounds = array<i64: 8, 128>}]} {
    %c0_i32 = arith.constant 0 : i32
    %0 = arith.cmpi eq, %arg1, %c0_i32 : i32
    %1 = arith.extui %0 : i1 to i32
    %c0_i32_0 = arith.constant 0 : i32
    %2 = arith.cmpi ne, %1, %c0_i32_0 : i32
    scf.if %2 {
      %cst_47 = arith.constant 0.000000e+00 : f32
      %155 = vector.broadcast %cst_47 : f32 to vector<8x128xf32>
      %c0_48 = arith.constant 0 : index
      %c0_49 = arith.constant 0 : index
      %156 = vector.load %arg7[%c0_48, %c0_49] : memref<8x128xf32, #tpu.memory_space<vmem>>, vector<8x128xf32>
      tpu.vector_store %arg7[%c0_48, %c0_49], %155 {strides = array<i32>} : memref<8x128xf32, #tpu.memory_space<vmem>>, vector<8x128xf32>,
      %cst_50 = arith.constant 0.000000e+00 : f32
      %157 = vector.broadcast %cst_50 : f32 to vector<8x128xf32>
      %c0_51 = arith.constant 0 : index
      %c0_52 = arith.constant 0 : index
      %158 = vector.load %arg8[%c0_51, %c0_52] : memref<8x128xf32, #tpu.memory_space<vmem>>, vector<8x128xf32>
      tpu.vector_store %arg8[%c0_51, %c0_52], %157 {strides = array<i32>} : memref<8x128xf32, #tpu.memory_space<vmem>>, vector<8x128xf32>,
    } else {
    }
    %c1_i32 = arith.constant 1 : i32
    %3 = arith.muli %arg0, %c1_i32 : i32
    %4 = arith.addi %3, %arg1 : i32
    %c8_i32 = arith.constant 8 : i32
    %5 = arith.muli %4, %c8_i32 : i32
    %c8_i32_1 = arith.constant 8 : i32
    %6 = arith.subi %c8_i32_1, %5 : i32
    %7 = tpu.iota {dimensions = array<i32: 0>} : vector<8x1xi32>
    %8 = vector.broadcast %6 : i32 to vector<8x1xi32>
    %9 = arith.cmpi slt, %7, %8 : vector<8x1xi32>
    %c0 = arith.constant 0 : index
    %c0_2 = arith.constant 0 : index
    %10 = vector.load %arg2[%c0, %c0_2] : memref<8x15xf32, #tpu.memory_space<vmem>>, vector<8x15xf32>
    %11 = vector.extract_strided_slice %10 {offsets = [0, 0], sizes = [8, 6], strides = [1, 1]} : vector<8x15xf32> to vector<8x6xf32>
    %c0_3 = arith.constant 0 : index
    %c0_4 = arith.constant 0 : index
    %12 = vector.load %arg3[%c0_3, %c0_4] : memref<8x6xf32, #tpu.memory_space<vmem>>, vector<8x6xf32>
    %13 = arith.subf %11, %12 : vector<8x6xf32>
    %cst = arith.constant 0.000000e+00 : f32
    %14 = vector.shape_cast %9 : vector<8x1xi1> to vector<8x1xi1>
    %15 = vector.broadcast %14 : vector<8x1xi1> to vector<8x6xi1>
    %16 = vector.broadcast %cst : f32 to vector<8x6xf32>
    %17 = arith.select %15, %13, %16 : vector<8x6xi1>, vector<8x6xf32>
    %18 = arith.mulf %17, %17 : vector<8x6xf32>
    %19 = vector.shape_cast %18 : vector<8x6xf32> to vector<1x8x6xf32>
    %cst_5 = arith.constant dense<0.000000e+00> : vector<1xf32>
    %20 = vector.multi_reduction <add>, %19, %cst_5 [1, 2] : vector<1x8x6xf32> to vector<1xf32>
    %21 = vector.shape_cast %20 : vector<1xf32> to vector<1x1x1xf32>
    %22 = vector.extract %21[0, 0, 0] : f32 from vector<1x1x1xf32>
    %23 = vector.broadcast %22 : f32 to vector<1x1xf32>
    %cst_6 = arith.constant 0.000000e+00 : f32
    %24 = vector.broadcast %cst_6 : f32 to vector<1x1xf32>
    %25 = tpu.iota {dimensions = array<i32: 1>} : vector<1x15xi32>
    %cst_7 = arith.constant 0.000000e+00 : f32
    %26 = vector.broadcast %cst_7 : f32 to vector<8x15xf32>
    %c6_i32 = arith.constant 6 : i32
    %27 = vector.broadcast %c6_i32 : i32 to vector<1x15xi32>
    %28 = arith.cmpi sge, %25, %27 : vector<1x15xi32>
    %c10_i32 = arith.constant 10 : i32
    %29 = vector.broadcast %c10_i32 : i32 to vector<1x15xi32>
    %30 = arith.cmpi slt, %25, %29 : vector<1x15xi32>
    %31 = arith.andi %28, %30 : vector<1x15xi1>
    %32 = vector.broadcast %31 : vector<1x15xi1> to vector<8x15xi1>
    %33 = vector.broadcast %9 : vector<8x1xi1> to vector<8x15xi1>
    %34 = arith.andi %32, %33 : vector<8x15xi1>
    %cst_8 = arith.constant -1.000000e+30 : f32
    %35 = vector.broadcast %cst_8 : f32 to vector<8x15xf32>
    %36 = arith.select %34, %10, %35 : vector<8x15xi1>, vector<8x15xf32>
    %cst_9 = arith.constant dense<0xFF800000> : vector<8xf32>
    %37 = vector.multi_reduction <maximumf>, %36, %cst_9 [1] : vector<8x15xf32> to vector<8xf32>
    %38 = vector.shape_cast %37 : vector<8xf32> to vector<8x1xf32>
    %cst_10 = arith.constant 0.000000e+00 : f32
    %39 = vector.shape_cast %31 : vector<1x15xi1> to vector<1x15xi1>
    %40 = vector.broadcast %39 : vector<1x15xi1> to vector<8x15xi1>
    %41 = vector.shape_cast %38 : vector<8x1xf32> to vector<8x1xf32>
    %42 = vector.broadcast %41 : vector<8x1xf32> to vector<8x15xf32>
    %43 = vector.broadcast %cst_10 : f32 to vector<8x15xf32>
    %44 = arith.select %40, %42, %43 : vector<8x15xi1>, vector<8x15xf32>
    %45 = arith.addf %26, %44 : vector<8x15xf32>
    %c10_i32_11 = arith.constant 10 : i32
    %46 = vector.broadcast %c10_i32_11 : i32 to vector<1x15xi32>
    %47 = arith.cmpi sge, %25, %46 : vector<1x15xi32>
    %c15_i32 = arith.constant 15 : i32
    %48 = vector.broadcast %c15_i32 : i32 to vector<1x15xi32>
    %49 = arith.cmpi slt, %25, %48 : vector<1x15xi32>
    %50 = arith.andi %47, %49 : vector<1x15xi1>
    %51 = vector.broadcast %50 : vector<1x15xi1> to vector<8x15xi1>
    %52 = vector.broadcast %9 : vector<8x1xi1> to vector<8x15xi1>
    %53 = arith.andi %51, %52 : vector<8x15xi1>
    %cst_12 = arith.constant -1.000000e+30 : f32
    %54 = vector.broadcast %cst_12 : f32 to vector<8x15xf32>
    %55 = arith.select %53, %10, %54 : vector<8x15xi1>, vector<8x15xf32>
    %cst_13 = arith.constant dense<0xFF800000> : vector<8xf32>
    %56 = vector.multi_reduction <maximumf>, %55, %cst_13 [1] : vector<8x15xf32> to vector<8xf32>
    %57 = vector.shape_cast %56 : vector<8xf32> to vector<8x1xf32>
    %cst_14 = arith.constant 0.000000e+00 : f32
    %58 = vector.shape_cast %50 : vector<1x15xi1> to vector<1x15xi1>
    %59 = vector.broadcast %58 : vector<1x15xi1> to vector<8x15xi1>
    %60 = vector.shape_cast %57 : vector<8x1xf32> to vector<8x1xf32>
    %61 = vector.broadcast %60 : vector<8x1xf32> to vector<8x15xf32>
    %62 = vector.broadcast %cst_14 : f32 to vector<8x15xf32>
    %63 = arith.select %59, %61, %62 : vector<8x15xi1>, vector<8x15xf32>
    %64 = arith.addf %45, %63 : vector<8x15xf32>
    %c6_i32_15 = arith.constant 6 : i32
    %65 = vector.broadcast %c6_i32_15 : i32 to vector<1x15xi32>
    %66 = arith.cmpi sge, %25, %65 : vector<1x15xi32>
    %c15_i32_16 = arith.constant 15 : i32
    %67 = vector.broadcast %c15_i32_16 : i32 to vector<1x15xi32>
    %68 = arith.cmpi slt, %25, %67 : vector<1x15xi32>
    %69 = arith.andi %66, %68 : vector<1x15xi1>
    %70 = vector.broadcast %69 : vector<1x15xi1> to vector<8x15xi1>
    %71 = vector.broadcast %9 : vector<8x1xi1> to vector<8x15xi1>
    %72 = arith.andi %70, %71 : vector<8x15xi1>
    %73 = arith.subf %10, %64 : vector<8x15xf32>
    %cst_17 = arith.constant -1.000000e+30 : f32
    %74 = vector.broadcast %cst_17 : f32 to vector<8x15xf32>
    %75 = arith.select %72, %73, %74 : vector<8x15xi1>, vector<8x15xf32>
    %76 = math.exp %75 : vector<8x15xf32>
    %cst_18 = arith.constant 0.000000e+00 : f32
    %77 = vector.broadcast %cst_18 : f32 to vector<8x15xf32>
    %c6_i32_19 = arith.constant 6 : i32
    %78 = vector.broadcast %c6_i32_19 : i32 to vector<1x15xi32>
    %79 = arith.cmpi sge, %25, %78 : vector<1x15xi32>
    %c10_i32_20 = arith.constant 10 : i32
    %80 = vector.broadcast %c10_i32_20 : i32 to vector<1x15xi32>
    %81 = arith.cmpi slt, %25, %80 : vector<1x15xi32>
    %82 = arith.andi %79, %81 : vector<1x15xi1>
    %cst_21 = arith.constant 0.000000e+00 : f32
    %83 = vector.shape_cast %82 : vector<1x15xi1> to vector<1x15xi1>
    %84 = vector.broadcast %83 : vector<1x15xi1> to vector<8x15xi1>
    %85 = vector.broadcast %cst_21 : f32 to vector<8x15xf32>
    %86 = arith.select %84, %76, %85 : vector<8x15xi1>, vector<8x15xf32>
    %cst_22 = arith.constant dense<0.000000e+00> : vector<8xf32>
    %87 = vector.multi_reduction <add>, %86, %cst_22 [1] : vector<8x15xf32> to vector<8xf32>
    %88 = vector.shape_cast %87 : vector<8xf32> to vector<8x1xf32>
    %89 = math.log %88 : vector<8x1xf32>
    %cst_23 = arith.constant 0.000000e+00 : f32
    %90 = vector.shape_cast %82 : vector<1x15xi1> to vector<1x15xi1>
    %91 = vector.broadcast %90 : vector<1x15xi1> to vector<8x15xi1>
    %92 = vector.shape_cast %89 : vector<8x1xf32> to vector<8x1xf32>
    %93 = vector.broadcast %92 : vector<8x1xf32> to vector<8x15xf32>
    %94 = vector.broadcast %cst_23 : f32 to vector<8x15xf32>
    %95 = arith.select %91, %93, %94 : vector<8x15xi1>, vector<8x15xf32>
    %96 = arith.addf %77, %95 : vector<8x15xf32>
    %c10_i32_24 = arith.constant 10 : i32
    %97 = vector.broadcast %c10_i32_24 : i32 to vector<1x15xi32>
    %98 = arith.cmpi sge, %25, %97 : vector<1x15xi32>
    %c15_i32_25 = arith.constant 15 : i32
    %99 = vector.broadcast %c15_i32_25 : i32 to vector<1x15xi32>
    %100 = arith.cmpi slt, %25, %99 : vector<1x15xi32>
    %101 = arith.andi %98, %100 : vector<1x15xi1>
    %cst_26 = arith.constant 0.000000e+00 : f32
    %102 = vector.shape_cast %101 : vector<1x15xi1> to vector<1x15xi1>
    %103 = vector.broadcast %102 : vector<1x15xi1> to vector<8x15xi1>
    %104 = vector.broadcast %cst_26 : f32 to vector<8x15xf32>
    %105 = arith.select %103, %76, %104 : vector<8x15xi1>, vector<8x15xf32>
    %cst_27 = arith.constant dense<0.000000e+00> : vector<8xf32>
    %106 = vector.multi_reduction <add>, %105, %cst_27 [1] : vector<8x15xf32> to vector<8xf32>
    %107 = vector.shape_cast %106 : vector<8xf32> to vector<8x1xf32>
    %108 = math.log %107 : vector<8x1xf32>
    %cst_28 = arith.constant 0.000000e+00 : f32
    %109 = vector.shape_cast %101 : vector<1x15xi1> to vector<1x15xi1>
    %110 = vector.broadcast %109 : vector<1x15xi1> to vector<8x15xi1>
    %111 = vector.shape_cast %108 : vector<8x1xf32> to vector<8x1xf32>
    %112 = vector.broadcast %111 : vector<8x1xf32> to vector<8x15xf32>
    %113 = vector.broadcast %cst_28 : f32 to vector<8x15xf32>
    %114 = arith.select %110, %112, %113 : vector<8x15xi1>, vector<8x15xf32>
    %115 = arith.addf %96, %114 : vector<8x15xf32>
    %116 = arith.subf %10, %64 : vector<8x15xf32>
    %117 = arith.subf %116, %115 : vector<8x15xf32>
    %c0_29 = arith.constant 0 : index
    %c0_30 = arith.constant 0 : index
    %118 = vector.load %arg4[%c0_29, %c0_30] : memref<8x4xf32, #tpu.memory_space<vmem>>, vector<8x4xf32>
    %119 = vector.extract_strided_slice %117 {offsets = [0, 6], sizes = [8, 4], strides = [1, 1]} : vector<8x15xf32> to vector<8x4xf32>
    %120 = arith.mulf %118, %119 : vector<8x4xf32>
    %cst_31 = arith.constant 0.000000e+00 : f32
    %121 = vector.shape_cast %9 : vector<8x1xi1> to vector<8x1xi1>
    %122 = vector.broadcast %121 : vector<8x1xi1> to vector<8x4xi1>
    %123 = vector.broadcast %cst_31 : f32 to vector<8x4xf32>
    %124 = arith.select %122, %120, %123 : vector<8x4xi1>, vector<8x4xf32>
    %125 = vector.shape_cast %124 : vector<8x4xf32> to vector<1x8x4xf32>
    %cst_32 = arith.constant dense<0.000000e+00> : vector<1xf32>
    %126 = vector.multi_reduction <add>, %125, %cst_32 [1, 2] : vector<1x8x4xf32> to vector<1xf32>
    %127 = vector.shape_cast %126 : vector<1xf32> to vector<1x1x1xf32>
    %128 = vector.extract %127[0, 0, 0] : f32 from vector<1x1x1xf32>
    %129 = vector.broadcast %128 : f32 to vector<1x1xf32>
    %130 = arith.subf %24, %129 : vector<1x1xf32>
    %c0_33 = arith.constant 0 : index
    %c0_34 = arith.constant 0 : index
    %131 = vector.load %arg5[%c0_33, %c0_34] : memref<8x5xf32, #tpu.memory_space<vmem>>, vector<8x5xf32>
    %132 = vector.extract_strided_slice %117 {offsets = [0, 10], sizes = [8, 5], strides = [1, 1]} : vector<8x15xf32> to vector<8x5xf32>
    %133 = arith.mulf %131, %132 : vector<8x5xf32>
    %cst_35 = arith.constant 0.000000e+00 : f32
    %134 = vector.shape_cast %9 : vector<8x1xi1> to vector<8x1xi1>
    %135 = vector.broadcast %134 : vector<8x1xi1> to vector<8x5xi1>
    %136 = vector.broadcast %cst_35 : f32 to vector<8x5xf32>
    %137 = arith.select %135, %133, %136 : vector<8x5xi1>, vector<8x5xf32>
    %138 = vector.shape_cast %137 : vector<8x5xf32> to vector<1x8x5xf32>
    %cst_36 = arith.constant dense<0.000000e+00> : vector<1xf32>
    %139 = vector.multi_reduction <add>, %138, %cst_36 [1, 2] : vector<1x8x5xf32> to vector<1xf32>
    %140 = vector.shape_cast %139 : vector<1xf32> to vector<1x1x1xf32>
    %141 = vector.extract %140[0, 0, 0] : f32 from vector<1x1x1xf32>
    %142 = vector.broadcast %141 : f32 to vector<1x1xf32>
    %143 = arith.subf %130, %142 : vector<1x1xf32>
    %c0_37 = arith.constant 0 : index
    %c0_38 = arith.constant 0 : index
    %144 = vector.load %arg7[%c0_37, %c0_38] : memref<8x128xf32, #tpu.memory_space<vmem>>, vector<8x128xf32>
    %145 = vector.broadcast %23 : vector<1x1xf32> to vector<8x128xf32>
    %146 = arith.addf %144, %145 : vector<8x128xf32>
    %c0_39 = arith.constant 0 : index
    %c0_40 = arith.constant 0 : index
    %147 = vector.load %arg7[%c0_39, %c0_40] : memref<8x128xf32, #tpu.memory_space<vmem>>, vector<8x128xf32>
    tpu.vector_store %arg7[%c0_39, %c0_40], %146 {strides = array<i32>} : memref<8x128xf32, #tpu.memory_space<vmem>>, vector<8x128xf32>,
    %c0_41 = arith.constant 0 : index
    %c0_42 = arith.constant 0 : index
    %148 = vector.load %arg8[%c0_41, %c0_42] : memref<8x128xf32, #tpu.memory_space<vmem>>, vector<8x128xf32>
    %149 = vector.broadcast %143 : vector<1x1xf32> to vector<8x128xf32>
    %150 = arith.addf %148, %149 : vector<8x128xf32>
    %c0_43 = arith.constant 0 : index
    %c0_44 = arith.constant 0 : index
    %151 = vector.load %arg8[%c0_43, %c0_44] : memref<8x128xf32, #tpu.memory_space<vmem>>, vector<8x128xf32>
    tpu.vector_store %arg8[%c0_43, %c0_44], %150 {strides = array<i32>} : memref<8x128xf32, #tpu.memory_space<vmem>>, vector<8x128xf32>,
    %c0_i32_45 = arith.constant 0 : i32
    %152 = arith.cmpi eq, %arg1, %c0_i32_45 : i32
    %153 = arith.extui %152 : i1 to i32
    %c0_i32_46 = arith.constant 0 : i32
    %154 = arith.cmpi ne, %153, %c0_i32_46 : i32
    scf.if %154 {
      %155 = tpu.iota {dimensions = array<i32: 0>} : vector<8x128xi32>
      %156 = tpu.iota {dimensions = array<i32: 1>} : vector<8x128xi32>
      %c0_i32_47 = arith.constant 0 : i32
      %157 = vector.broadcast %c0_i32_47 : i32 to vector<8x128xi32>
      %158 = arith.cmpi eq, %155, %157 : vector<8x128xi32>
      %c0_i32_48 = arith.constant 0 : i32
      %159 = vector.broadcast %c0_i32_48 : i32 to vector<8x128xi32>
      %160 = arith.cmpi eq, %156, %159 : vector<8x128xi32>
      %161 = arith.andi %158, %160 : vector<8x128xi1>
      %c0_i32_49 = arith.constant 0 : i32
      %162 = vector.broadcast %c0_i32_49 : i32 to vector<8x128xi32>
      %163 = arith.cmpi eq, %155, %162 : vector<8x128xi32>
      %c1_i32_50 = arith.constant 1 : i32
      %164 = vector.broadcast %c1_i32_50 : i32 to vector<8x128xi32>
      %165 = arith.cmpi eq, %156, %164 : vector<8x128xi32>
      %166 = arith.andi %163, %165 : vector<8x128xi1>
      %c0_51 = arith.constant 0 : index
      %c0_52 = arith.constant 0 : index
      %167 = vector.load %arg7[%c0_51, %c0_52] : memref<8x128xf32, #tpu.memory_space<vmem>>, vector<8x128xf32>
      %cst_53 = arith.constant 0.000000e+00 : f32
      %168 = vector.broadcast %cst_53 : f32 to vector<8x128xf32>
      %169 = arith.select %161, %167, %168 : vector<8x128xi1>, vector<8x128xf32>
      %c0_54 = arith.constant 0 : index
      %c0_55 = arith.constant 0 : index
      %170 = vector.load %arg8[%c0_54, %c0_55] : memref<8x128xf32, #tpu.memory_space<vmem>>, vector<8x128xf32>
      %cst_56 = arith.constant 0.000000e+00 : f32
      %171 = vector.broadcast %cst_56 : f32 to vector<8x128xf32>
      %172 = arith.select %166, %170, %171 : vector<8x128xi1>, vector<8x128xf32>
      %173 = arith.addf %169, %172 : vector<8x128xf32>
      %c0_57 = arith.constant 0 : index
      %c0_58 = arith.constant 0 : index
      %174 = vector.load %arg6[%c0_57, %c0_58] : memref<8x128xf32, #tpu.memory_space<vmem>>, vector<8x128xf32>
      tpu.vector_store %arg6[%c0_57, %c0_58], %173 {strides = array<i32>} : memref<8x128xf32, #tpu.memory_space<vmem>>, vector<8x128xf32>,
    } else {
    }
    return
  }
  func.func @transform_0(%arg0: i32, %arg1: i32) -> (i32, i32) {
    %c1_i32 = arith.constant 1 : i32
    %0 = arith.muli %arg0, %c1_i32 : i32
    %1 = arith.addi %0, %arg1 : i32
    %c0_i32 = arith.constant 0 : i32
    %2 = arith.minsi %1, %c0_i32 : i32
    %c0_i32_0 = arith.constant 0 : i32
    %c0_i32_1 = arith.constant 0 : i32
    return %2, %c0_i32_0 : i32, i32
  }
  func.func @transform_1(%arg0: i32, %arg1: i32) -> (i32, i32) {
    %c1_i32 = arith.constant 1 : i32
    %0 = arith.muli %arg0, %c1_i32 : i32
    %1 = arith.addi %0, %arg1 : i32
    %c0_i32 = arith.constant 0 : i32
    %2 = arith.minsi %1, %c0_i32 : i32
    %c0_i32_0 = arith.constant 0 : i32
    %c0_i32_1 = arith.constant 0 : i32
    return %2, %c0_i32_0 : i32, i32
  }
  func.func @transform_2(%arg0: i32, %arg1: i32) -> (i32, i32) {
    %c1_i32 = arith.constant 1 : i32
    %0 = arith.muli %arg0, %c1_i32 : i32
    %1 = arith.addi %0, %arg1 : i32
    %c0_i32 = arith.constant 0 : i32
    %2 = arith.minsi %1, %c0_i32 : i32
    %c0_i32_0 = arith.constant 0 : i32
    %c0_i32_1 = arith.constant 0 : i32
    return %2, %c0_i32_0 : i32, i32
  }
  func.func @transform_3(%arg0: i32, %arg1: i32) -> (i32, i32) {
    %c1_i32 = arith.constant 1 : i32
    %0 = arith.muli %arg0, %c1_i32 : i32
    %1 = arith.addi %0, %arg1 : i32
    %c0_i32 = arith.constant 0 : i32
    %2 = arith.minsi %1, %c0_i32 : i32
    %c0_i32_0 = arith.constant 0 : i32
    %c0_i32_1 = arith.constant 0 : i32
    return %2, %c0_i32_0 : i32, i32
  }
  func.func @transform_4(%arg0: i32, %arg1: i32) -> (i32, i32) {
    %c0_i32 = arith.constant 0 : i32
    %c0_i32_0 = arith.constant 0 : i32
    return %arg0, %c0_i32 : i32, i32
  }
}

</mosaic_0001>

<bundles_post_ra>
// kernel: tpu_custom_call.1
= control target key start
LH: loop header
LB: loop body
LE: loop exit
PB: predicated region body
PF: predicated region fallthrough
CT: control target
= control target key end

     0   :  { %9 = vsyncpa [#allocation5], 0  ;;  %s439_s0 = inlined_call_operand.vmem [shape: f32[8,15], index: 0, kind: input, shape index: {}]   ;;  %s440_s1 = inlined_call_operand.hbm [shape: f32[8,6], index: 1, kind: input, shape index: {}]   ;;  %s441_s2 = inlined_call_operand.vmem [shape: f32[8,4], index: 2, kind: input, shape index: {}]   ;;  %s442_s3 = inlined_call_operand.vmem [shape: f32[8,5], index: 3, kind: input, shape index: {}]   ;;  %s443_s4 = inlined_call_operand.hbm [shape: f32[8,128], index: 4, kind: output, shape index: {}]  }
   0x1   :  { %10 = vsyncpa [#allocation6], 0  ;;  %s357_s15 = smov [#allocation4]  }
   0x2   :  { %s34_s16 = sshll.u32 %s357_s15, 4  ;;  %s35_s16 = int_to_ptr.vmem [resolvable:$true] %s34_s16 }
   0x3   :  { %s321_s17 = scalar_lea.vmem %s35_s16, 128  ;;  %p326_p1 = scmp.lt.s32.totalorder %s35_s16, %s35_s16 }
   0x4   :  { %p322_p0 = scmp.ne.s32.totalorder %s35_s16, %s321_s17  ;;  %p327_p2 = scmp.lt.s32.totalorder %s321_s17, %s321_s17 }
   0x6   :  { %p328_p3 = por %p327_p2, %p326_p1 }
   0x8   :  { %p329_p4 = pnand %p328_p3, %p322_p0 }
   0xa   :  { %332 = shalt.err (!%p329_p4)
}
   0xb   :  { %37 = dma.hbm_to_vmem [thread:$0]  %s440_s1, 128, %s35_s16, [#allocation5]  }
   0xc   :  { %353 = dma.done.wait [#allocation5], 128  }
   0xd   :  { %354 = vsyncadd [#allocation5], 4294967168  ;;  %v128_v0 = vlaneseq  ;;  %vm159_vm5 = vcmask 121856   ;;  %v132_v4 = vld [vmem:[%s439_s0] sm:$0xff]  ;;  %s358_s0 = smov 118   ;;  %s359_s21 = smov 122  }
   0xe   :  { %v133_v32 = vld [vmem:[#allocation4] sm:$0xff]  ;;  %vm139_vm8 = vcmask 48128   ;;  %vm209_vm9 = vcmask 31744   ;;  %vm228_vm10 = vcmask 39936   ;;  %s360_s27 = smov [#allocation7]  }
   0xf   :  { %v390_v1 = vand.u32 127, %v128_v0  ;;  %v134_v33 = vsub.f32 %v132_v4, %v133_v32  ;;  %v202_v36 = vld [vmem:[%s441_s2] sm:$0xff]  ;;  %v129_v3 = vshrl.u32 %v128_v0, 7  ;;  %s268_s28 = sshll.u32 %s360_s27, 4  ;;  %s269_s28 = int_to_ptr.vmem [resolvable:$true] %s268_s28 }
  0x10   :  { %v222_v37 = vld [vmem:[%s442_s3] sm:$0xff]  ;;  %s333_s29 = scalar_lea.vmem %s269_s28, 128  ;;  %p338_p6 = scmp.lt.s32.totalorder %s269_s28, %s269_s28 }
  0x11   :  { %vm152_vm0 = vcmp.ge.s32.totalorder %v390_v1, 6  ;;  %vm153_vm1 = vcmp.lt.s32.totalorder %v390_v1, 10  ;;  %vm165_vm2 = vcmp.ge.s32.totalorder %v390_v1, 10  ;;  %vm166_vm3 = vcmp.lt.s32.totalorder %v390_v1, 15  ;;  %p334_p5 = scmp.ne.s32.totalorder %s269_s28, %s333_s29  ;;  %p339_p7 = scmp.lt.s32.totalorder %s333_s29, %s333_s29 }
  0x12   :  { %vm396_vm4 = vmand %vm152_vm0, %vm153_vm1  ;;  %v138_v34 = vmul.f32 %v134_v33, %v134_v33  ;;  %vm251_vm11 = vcmp.eq.s32.totalorder %v129_v3, 0  ;;  %vm252_vm12 = vcmp.eq.s32.totalorder %v390_v1, 0  ;;  %vm254_vm13 = vcmp.eq.s32.totalorder %v390_v1, 1 }
  0x13   :  { %vm400_vm6 = vmand %vm165_vm2, %vm166_vm3  ;;  %v158_v5 = vsel %vm396_vm4, %v132_v4, -1e+30  ;;  %p340_p8 = por %p339_p7, %p338_p6 }
  0x14   :  { %v171_v6 = vsel %vm400_vm6, %v132_v4, -1e+30  ;;  %v160_v7 = vsel %vm159_vm5, %v158_v5, -inf  ;;  %vm177_vm7 = vmand %vm152_vm0, %vm166_vm3  ;;  %v140_v35 = vsel %vm139_vm8, %v138_v34, 0.0 }
  0x15   :  { %161 = vmax.xlane.f32.xlu0 %v160_v7  ;;  %v172_v8 = vsel %vm159_vm5, %v171_v6, -inf  ;;  %vm253_vm14 = vmand %vm251_vm11, %vm252_vm12  ;;  %p341_p9 = pnand %p340_p8, %p334_p5 }
  0x16   :  { %vm255_vm15 = vmand %vm251_vm11, %vm254_vm13 }
  0x19   :  { %173 = vmax.xlane.f32.xlu0 %v172_v8 }
  0x9e   :  { %v162_v9 = vpop.xlane.xlu0 %161 }
  0x9f   :  { %v163_v11 = vsel %vm396_vm4, %v162_v9, 0.0 }
  0xa2   :  { %v174_v10 = vpop.xlane.xlu0 %173 }
  0xa3   :  { %v175_v12 = vsel %vm400_vm6, %v174_v10, 0.0 }
  0xa4   :  { %v176_v13 = vadd.f32 %v175_v12, %v163_v11 }
  0xa6   :  { %v181_v14 = vsub.f32 %v132_v4, %v176_v13 }
  0xa8   :  { %v182_v15 = vsel %vm177_vm7, %v181_v14, -1e+30 }
  0xa9   :  { %v183_v16 = vmul.f32 1.442695, %v182_v15 }
  0xab   :  { %307 = vpow2.f32 %v183_v16 }
  0xb8   :  { %v308_v17 = vpop.eup %307 }
  0xb9   :  { %v185_v18 = vsel %vm396_vm4, %v308_v17, 0.0  ;;  %v193_v20 = vsel %vm400_vm6, %v308_v17, 0.0 }
  0xba   :  { %v186_v19 = vsel %vm159_vm5, %v185_v18, 0.0  ;;  %v194_v21 = vsel %vm159_vm5, %v193_v20, 0.0 }
  0xbb   :  { %187 = vadd.xlane.f32.xlu1 %v186_v19 }
  0xbf   :  { %195 = vadd.xlane.f32.xlu1 %v194_v21 }
 0x144   :  { %v188_v22 = vpop.xlane.xlu1 %187 }
 0x145   :  { %309 = vlog2.f32 %v188_v22 }
 0x148   :  { %v196_v23 = vpop.xlane.xlu1 %195 }
 0x149   :  { %311 = vlog2.f32 %v196_v23 }
 0x152   :  { %v310_v24 = vpop.eup %309 }
 0x153   :  { %v190_v25 = vmul.f32 0.6931472, %v310_v24 }
 0x155   :  { %v191_v28 = vsel %vm396_vm4, %v190_v25, 0.0 }
 0x156   :  { %v312_v26 = vpop.eup %311 }
 0x157   :  { %v198_v27 = vmul.f32 0.6931472, %v312_v26 }
 0x159   :  { %v199_v29 = vsel %vm400_vm6, %v198_v27, 0.0 }
 0x15a   :  { %v200_v30 = vadd.f32 %v199_v29, %v191_v28 }
 0x15c   :  { %v201_v31 = vsub.f32 %v181_v14, %v200_v30 }
 0x15e   :  { %223 = vrot.lane.b32.xlu1 %v201_v31, %s358_s0  ;;  %204 = vrot.lane.b32.xlu0 %v201_v31, %s359_s21 }
 0x182   :  { %141 = vadd.xlane.f32.xlu1 %v140_v35 }
 0x1d0   :  { %v224_v38 = vpop.permute.xlu1 %223  ;;  %v205_v39 = vpop.permute.xlu0 %204 }
 0x1d1   :  { %v207_v40 = vmul.f32 %v205_v39, %v202_v36  ;;  %v226_v41 = vmul.f32 %v224_v38, %v222_v37 }
 0x1d3   :  { %v210_v42 = vsel %vm209_vm9, %v207_v40, 0.0  ;;  %v229_v43 = vsel %vm228_vm10, %v226_v41, 0.0 }
 0x1d4   :  { %211 = vadd.xlane.f32.xlu0 %v210_v42 }
 0x1d8   :  { %230 = vadd.xlane.f32.xlu0 %v229_v43 }
 0x20b   :  { %v142_v44 = vpop.xlane.xlu1 %141 }
 0x20c   :  { %v143_v45 = vrot.slane %v142_v44, 4 }
 0x20e   :  { %v144_v46 = vadd.f32 %v143_v45, %v142_v44 }
 0x210   :  { %v145_v47 = vrot.slane %v144_v46, 2 }
 0x212   :  { %v146_v48 = vadd.f32 %v145_v47, %v144_v46 }
 0x214   :  { %v147_v49 = vrot.slane %v146_v48, 1 }
 0x216   :  { %v148_v50 = vadd.f32 %v147_v49, %v146_v48 }
 0x218   :  { %297 = vpush %v148_v50 }
 0x249   :  { %s298_s2 = spop %297 }
 0x24a   :  { %v242_v6 = vstv %s298_s2 }
 0x24b   :  { %v257_v9 = vsel %vm253_vm14, %v242_v6, 0.0 }
 0x25d   :  { %v212_v51 = vpop.xlane.xlu0 %211 }
 0x25e   :  { %v213_v52 = vrot.slane %v212_v51, 4 }
 0x260   :  { %v214_v53 = vadd.f32 %v213_v52, %v212_v51 }
 0x261   :  { %v231_v54 = vpop.xlane.xlu0 %230 }
 0x262   :  { %v215_v55 = vrot.slane %v214_v53, 2  ;;  %v232_v56 = vrot.slane %v231_v54, 4 }
 0x264   :  { %v233_v57 = vadd.f32 %v232_v56, %v231_v54  ;;  %v216_v58 = vadd.f32 %v215_v55, %v214_v53 }
 0x266   :  { %v234_v59 = vrot.slane %v233_v57, 2  ;;  %v217_v60 = vrot.slane %v216_v58, 1 }
 0x268   :  { %v235_v61 = vadd.f32 %v234_v59, %v233_v57  ;;  %v218_v62 = vadd.f32 %v217_v60, %v216_v58 }
 0x26a   :  { %299 = vpush %v218_v62  ;;  %v236_v63 = vrot.slane %v235_v61, 1 }
 0x26c   :  { %v237_v2 = vadd.f32 %v236_v63, %v235_v61 }
 0x26e   :  { %301 = vpush %v237_v2 }
 0x29b   :  { %s300_s3 = spop %299 }
 0x29c   :  { %v220_v4 = vstv %s300_s3 }
 0x29d   :  { %v221_v5 = vsub.f32 0.0, %v220_v4 }
 0x29f   :  { %s302_s26 = spop %301 }
 0x2a0   :  { %v239_v7 = vstv %s302_s26 }
 0x2a1   :  { %v240_v8 = vsub.f32 %v221_v5, %v239_v7 }
 0x2a3   :  { %v259_v10 = vsel %vm255_vm15, %v240_v8, 0.0 }
 0x2a4   :  { %v260_v0 = vadd.f32 %v259_v10, %v257_v9 }
 0x2a6   :  { %261 = vst [vmem:[#allocation7] sm:$0xff] %v260_v0 }
 0x2a7   :  { %344 = shalt.err (!%p341_p9)
}
 0x2a8   :  { %271 = dma.vmem_to_hbm [thread:$0]  %s269_s28, 128, %s443_s4, [#allocation6]  }
 0x2a9   :  { %355 = dma.done.wait [#allocation6], 128  }
 0x2aa   :  { %356 = vsyncadd [#allocation6], 4294967168 }
 0x2ab   :  { %275 = vsyncpa [#allocation5], 1 }
 0x2ac   :  { %276 = vsyncpa [#allocation6], 1 }

</bundles_post_ra>
